<compile_context>
chip_gen: v7x
topology: tpu7x:2x2x1
jax: 0.10.0
libtpu: 0.0.40
codegen_flags: <defaults>
</compile_context>

<pallas_src>
import functools

import jax
import jax.numpy as jnp
from jax.experimental import pallas as pl
from jax.experimental.pallas import tpu as pltpu

EPS = 1e-5      # torch.nn.LayerNorm default
LANE = 128      # TPU lane width
N_VEC_ROWS = 16  # slab rows (9 used, padded to a sublane-friendly count)


def _round_up(x, m):
    return (x + m - 1) // m * m


def _layernorm_ref(h, gamma, beta):
    """Two-pass LayerNorm, matches torch.nn.LayerNorm (biased var, eps inside)."""
    mu = jnp.mean(h, axis=-1, keepdims=True)
    var = jnp.mean((h - mu) ** 2, axis=-1, keepdims=True)
    return (h - mu) * jax.lax.rsqrt(var + EPS) * gamma + beta


def _layernorm_padded(h, gamma, beta, n):
    """LayerNorm over logical width n on lane-padded data.

    Padded lanes of h, gamma, beta are zero, so sum / sum-of-squares divided by
    the logical width give the exact statistics, and the output stays zero in
    the padded lanes (gamma = beta = 0 there).
    """
    inv_n = 1.0 / float(n)
    mu = jnp.sum(h, axis=-1, keepdims=True) * inv_n
    msq = jnp.sum(h * h, axis=-1, keepdims=True) * inv_n
    var = jnp.maximum(msq - mu * mu, 0.0)
    return (h - mu) * jax.lax.rsqrt(var + EPS) * gamma + beta


@functools.partial(jax.jit, static_argnames=("batch_tile",))
def predictor_forward(obs, params, *, batch_tile=256):
    B, obs_dim = obs.shape
    hidden = params["w1"].shape[1]
    rep = params["wo"].shape[1]

    obs_pad = _round_up(obs_dim, LANE)
    h_pad = _round_up(hidden, LANE)
    r_pad = _round_up(rep, LANE)
    vec_w = max(obs_pad, h_pad, r_pad)

    # --- batch tiling (no divisibility requirement) ------------------------
    tile = min(batch_tile, _round_up(B, 8))
    b_pad = _round_up(B, tile)
    grid = b_pad // tile

    # --- pack / zero-pad parameters (done in XLA, outside the kernel) ------
    f32 = jnp.float32

    def _row(v):
        v = jnp.asarray(v, f32).reshape(-1)
        return jnp.pad(v, (0, vec_w - v.shape[0]))

    vec = jnp.stack(
        [
            _row(params["g0"]), _row(params["b0"]),     # rows 0,1: feature_norm
            _row(params["bb1"]),                        # row  2:  fc1 bias
            _row(params["g1"]), _row(params["b1"]),     # rows 3,4: fc1 LN
            _row(params["bb2"]),                        # row  5:  fc2 bias
            _row(params["g2"]), _row(params["b2"]),     # rows 6,7: fc2 LN
            _row(params["bo"]),                         # row  8:  out bias
        ],
        axis=0,
    )
    vec = jnp.pad(vec, ((0, N_VEC_ROWS - vec.shape[0]), (0, 0)))

    w1 = jnp.pad(jnp.asarray(params["w1"], f32),
                 ((0, obs_pad - obs_dim), (0, h_pad - hidden)))
    w2 = jnp.pad(jnp.asarray(params["w2"], f32),
                 ((0, h_pad - hidden), (0, h_pad - hidden)))
    wo = jnp.pad(jnp.asarray(params["wo"], f32),
                 ((0, h_pad - hidden), (0, r_pad - rep)))

    x = jnp.pad(jnp.asarray(obs, f32),
                ((0, b_pad - B), (0, obs_pad - obs_dim)))

    # --- fused kernel -------------------------------------------------------
    def kernel(x_ref, vec_ref, w1_ref, w2_ref, wo_ref, o_ref):
        xt = x_ref[...]
        v = vec_ref[...]  # (N_VEC_ROWS, vec_w), tiny

        g0, b0 = v[0:1, :obs_pad], v[1:2, :obs_pad]
        bb1, g1, b1 = v[2:3, :h_pad], v[3:4, :h_pad], v[4:5, :h_pad]
        bb2, g2, b2 = v[5:6, :h_pad], v[6:7, :h_pad], v[7:8, :h_pad]
        bo = v[8:9, :r_pad]

        # feature_norm over obs_dim
        h = _layernorm_padded(xt, g0, b0, obs_dim)

        # fc1: Linear -> ReLU -> LayerNorm
        h = jnp.dot(h, w1_ref[...], preferred_element_type=jnp.float32) + bb1
        h = jnp.maximum(h, 0.0)
        h = _layernorm_padded(h, g1, b1, hidden)

        # fc2[0]: Linear -> ReLU -> LayerNorm
        h = jnp.dot(h, w2_ref[...], preferred_element_type=jnp.float32) + bb2
        h = jnp.maximum(h, 0.0)
        h = _layernorm_padded(h, g2, b2, hidden)

        # out head (lane-dense r_pad-wide store; sliced in the wrapper)
        o_ref[...] = (
            jnp.dot(h, wo_ref[...], preferred_element_type=jnp.float32) + bo
        ).astype(o_ref.dtype)

    full = lambda shape: pl.BlockSpec(shape, lambda i: (0,) * len(shape))

    out = pl.pallas_call(
        kernel,
        out_shape=jax.ShapeDtypeStruct((b_pad, r_pad), jnp.float32),
        grid=(grid,),
        in_specs=[
            pl.BlockSpec((tile, obs_pad), lambda i: (i, 0)),   # obs tiles
            full((N_VEC_ROWS, vec_w)),                         # vector slab
            full((obs_pad, h_pad)),                            # w1
            full((h_pad, h_pad)),                              # w2
            full((h_pad, r_pad)),                              # wo
        ],
        out_specs=pl.BlockSpec((tile, r_pad), lambda i: (i, 0)),
        compiler_params=pltpu.CompilerParams(
            dimension_semantics=("parallel",),
        ),
    )(x, vec, w1, w2, wo)

    return out[:B, :rep]


def predictor_reference(obs, params):
    """Pure-JAX reference matching the PyTorch forward."""
    h = _layernorm_ref(obs.astype(jnp.float32), params["g0"], params["b0"])
    h = jnp.maximum(h @ params["w1"] + params["bb1"], 0.0)
    h = _layernorm_ref(h, params["g1"], params["b1"])
    h = jnp.maximum(h @ params["w2"] + params["bb2"], 0.0)
    h = _layernorm_ref(h, params["g2"], params["b2"])
    return h @ params["wo"] + params["bo"]


def init_params(key, obs_dim, hidden, rep):
    """Deterministic synthetic params (shapes match the torch module).

    Linear weights stored as [in, out] (x @ W + b == torch x @ W.T + b).
    Gammas / betas / biases are non-trivial so the test exercises them.
    """
    ks = jax.random.split(key, 12)
    f32 = jnp.float32
    n = lambda k, s, sc: jax.random.normal(k, s, f32) * sc
    return {
        "g0": 1.0 + n(ks[0], (1, obs_dim), 0.1), "b0": n(ks[1], (1, obs_dim), 0.1),
        "w1": n(ks[2], (obs_dim, hidden), 0.1), "bb1": n(ks[3], (1, hidden), 0.1),
        "g1": 1.0 + n(ks[4], (1, hidden), 0.1), "b1": n(ks[5], (1, hidden), 0.1),
        "w2": n(ks[6], (hidden, hidden), 0.1), "bb2": n(ks[7], (1, hidden), 0.1),
        "g2": 1.0 + n(ks[8], (1, hidden), 0.1), "b2": n(ks[9], (1, hidden), 0.1),
        "wo": n(ks[10], (hidden, rep), 0.1), "bo": n(ks[11], (1, rep), 0.1),
    }


if __name__ == "__main__":
    OBS_DIM, HIDDEN, REP = 24, 32, 16

    key = jax.random.PRNGKey(0)
    k_obs, k_par, k_obs2 = jax.random.split(key, 3)
    params = init_params(k_par, OBS_DIM, HIDDEN, REP)

    # Small demo batch (single grid step).
    B = 16
    obs = jax.random.normal(k_obs, (B, OBS_DIM), jnp.float32)
    out = jax.block_until_ready(predictor_forward(obs, params))
    ref = predictor_reference(obs, params)
    assert out.shape == (B, REP)
    assert jnp.allclose(out, ref, atol=1e-4, rtol=1e-4), "mismatch vs reference (B=16)"

    # Non-divisible batch exercising padding + a multi-step ("parallel") grid.
    B2 = 300
    obs2 = jax.random.normal(k_obs2, (B2, OBS_DIM), jnp.float32)
    out2 = jax.block_until_ready(predictor_forward(obs2, params, batch_tile=256))
    ref2 = predictor_reference(obs2, params)
    assert out2.shape == (B2, REP)
    assert jnp.allclose(out2, ref2, atol=1e-4, rtol=1e-4), "mismatch vs reference (B=300)"

    print("KERNEL_OK")
</pallas_src>

<mosaic_0001>
module attributes {stable_mosaic.version = 11 : i64} {
  func.func @kernel(%arg0: i32, %arg1: memref<16x128xf32, #tpu.memory_space<vmem>>, %arg2: memref<16x128xf32, #tpu.memory_space<vmem>>, %arg3: memref<128x128xf32, #tpu.memory_space<vmem>>, %arg4: memref<128x128xf32, #tpu.memory_space<vmem>>, %arg5: memref<128x128xf32, #tpu.memory_space<vmem>>, %arg6: memref<16x128xf32, #tpu.memory_space<vmem>>) attributes {dimension_semantics = [#tpu.dimension_semantics<parallel>], iteration_bounds = array<i64: 1>, scalar_prefetch = 0 : i64, scratch_operands = 0 : i64, tpu.core_type = #tpu.core_type<tc>, window_params = [{transform_indices = @transform_0, window_bounds = array<i64: 16, 128>}, {pipeline_mode = #tpu.pipeline_mode<synchronous>, transform_indices = @transform_1, window_bounds = array<i64: 16, 128>}, {pipeline_mode = #tpu.pipeline_mode<synchronous>, transform_indices = @transform_2, window_bounds = array<i64: 128, 128>}, {pipeline_mode = #tpu.pipeline_mode<synchronous>, transform_indices = @transform_3, window_bounds = array<i64: 128, 128>}, {pipeline_mode = #tpu.pipeline_mode<synchronous>, transform_indices = @transform_4, window_bounds = array<i64: 128, 128>}, {transform_indices = @transform_5, window_bounds = array<i64: 16, 128>}]} {
    %c0 = arith.constant 0 : index
    %c0_0 = arith.constant 0 : index
    %0 = vector.load %arg1[%c0, %c0_0] : memref<16x128xf32, #tpu.memory_space<vmem>>, vector<16x128xf32>
    %c0_1 = arith.constant 0 : index
    %c0_2 = arith.constant 0 : index
    %1 = vector.load %arg2[%c0_1, %c0_2] : memref<16x128xf32, #tpu.memory_space<vmem>>, vector<16x128xf32>
    %2 = vector.extract_strided_slice %1 {offsets = [0, 0], sizes = [1, 128], strides = [1, 1]} : vector<16x128xf32> to vector<1x128xf32>
    %3 = vector.extract_strided_slice %1 {offsets = [1, 0], sizes = [1, 128], strides = [1, 1]} : vector<16x128xf32> to vector<1x128xf32>
    %4 = vector.extract_strided_slice %1 {offsets = [2, 0], sizes = [1, 128], strides = [1, 1]} : vector<16x128xf32> to vector<1x128xf32>
    %5 = vector.extract_strided_slice %1 {offsets = [3, 0], sizes = [1, 128], strides = [1, 1]} : vector<16x128xf32> to vector<1x128xf32>
    %6 = vector.extract_strided_slice %1 {offsets = [4, 0], sizes = [1, 128], strides = [1, 1]} : vector<16x128xf32> to vector<1x128xf32>
    %7 = vector.extract_strided_slice %1 {offsets = [5, 0], sizes = [1, 128], strides = [1, 1]} : vector<16x128xf32> to vector<1x128xf32>
    %8 = vector.extract_strided_slice %1 {offsets = [6, 0], sizes = [1, 128], strides = [1, 1]} : vector<16x128xf32> to vector<1x128xf32>
    %9 = vector.extract_strided_slice %1 {offsets = [7, 0], sizes = [1, 128], strides = [1, 1]} : vector<16x128xf32> to vector<1x128xf32>
    %10 = vector.extract_strided_slice %1 {offsets = [8, 0], sizes = [1, 128], strides = [1, 1]} : vector<16x128xf32> to vector<1x128xf32>
    %cst = arith.constant dense<0.000000e+00> : vector<16xf32>
    %11 = vector.multi_reduction <add>, %0, %cst [1] : vector<16x128xf32> to vector<16xf32>
    %12 = vector.shape_cast %11 : vector<16xf32> to vector<16x1xf32>
    %cst_3 = arith.constant 0.0416666679 : f32
    %13 = vector.broadcast %cst_3 : f32 to vector<16x1xf32>
    %14 = arith.mulf %12, %13 : vector<16x1xf32>
    %15 = arith.mulf %0, %0 : vector<16x128xf32>
    %cst_4 = arith.constant dense<0.000000e+00> : vector<16xf32>
    %16 = vector.multi_reduction <add>, %15, %cst_4 [1] : vector<16x128xf32> to vector<16xf32>
    %17 = vector.shape_cast %16 : vector<16xf32> to vector<16x1xf32>
    %cst_5 = arith.constant 0.0416666679 : f32
    %18 = vector.broadcast %cst_5 : f32 to vector<16x1xf32>
    %19 = arith.mulf %17, %18 : vector<16x1xf32>
    %20 = arith.mulf %14, %14 : vector<16x1xf32>
    %21 = arith.subf %19, %20 : vector<16x1xf32>
    %cst_6 = arith.constant 0.000000e+00 : f32
    %22 = vector.broadcast %cst_6 : f32 to vector<16x1xf32>
    %23 = arith.maximumf %21, %22 : vector<16x1xf32>
    %24 = vector.broadcast %14 : vector<16x1xf32> to vector<16x128xf32>
    %25 = arith.subf %0, %24 : vector<16x128xf32>
    %cst_7 = arith.constant 9.99999974E-6 : f32
    %26 = vector.broadcast %cst_7 : f32 to vector<16x1xf32>
    %27 = arith.addf %23, %26 : vector<16x1xf32>
    %28 = math.rsqrt %27 : vector<16x1xf32>
    %29 = vector.broadcast %28 : vector<16x1xf32> to vector<16x128xf32>
    %30 = arith.mulf %25, %29 : vector<16x128xf32>
    %31 = vector.broadcast %2 : vector<1x128xf32> to vector<16x128xf32>
    %32 = arith.mulf %30, %31 : vector<16x128xf32>
    %33 = vector.broadcast %3 : vector<1x128xf32> to vector<16x128xf32>
    %34 = arith.addf %32, %33 : vector<16x128xf32>
    %c0_8 = arith.constant 0 : index
    %c0_9 = arith.constant 0 : index
    %35 = vector.load %arg3[%c0_8, %c0_9] : memref<128x128xf32, #tpu.memory_space<vmem>>, vector<128x128xf32>
    %cst_10 = arith.constant dense<0.000000e+00> : vector<16x128xf32>
    %36 = tpu.matmul %34, %35, %cst_10 {dimension_numbers = #tpu.dot_dimension_numbers<[1], [0], [0], [1], [0, 0, 1, 1], [], []>} : vector<16x128xf32>, vector<128x128xf32>, vector<16x128xf32> -> vector<16x128xf32>
    %37 = vector.broadcast %4 : vector<1x128xf32> to vector<16x128xf32>
    %38 = arith.addf %36, %37 : vector<16x128xf32>
    %cst_11 = arith.constant 0.000000e+00 : f32
    %39 = vector.broadcast %cst_11 : f32 to vector<16x128xf32>
    %40 = arith.maximumf %38, %39 : vector<16x128xf32>
    %cst_12 = arith.constant dense<0.000000e+00> : vector<16xf32>
    %41 = vector.multi_reduction <add>, %40, %cst_12 [1] : vector<16x128xf32> to vector<16xf32>
    %42 = vector.shape_cast %41 : vector<16xf32> to vector<16x1xf32>
    %cst_13 = arith.constant 3.125000e-02 : f32
    %43 = vector.broadcast %cst_13 : f32 to vector<16x1xf32>
    %44 = arith.mulf %42, %43 : vector<16x1xf32>
    %45 = arith.mulf %40, %40 : vector<16x128xf32>
    %cst_14 = arith.constant dense<0.000000e+00> : vector<16xf32>
    %46 = vector.multi_reduction <add>, %45, %cst_14 [1] : vector<16x128xf32> to vector<16xf32>
    %47 = vector.shape_cast %46 : vector<16xf32> to vector<16x1xf32>
    %cst_15 = arith.constant 3.125000e-02 : f32
    %48 = vector.broadcast %cst_15 : f32 to vector<16x1xf32>
    %49 = arith.mulf %47, %48 : vector<16x1xf32>
    %50 = arith.mulf %44, %44 : vector<16x1xf32>
    %51 = arith.subf %49, %50 : vector<16x1xf32>
    %cst_16 = arith.constant 0.000000e+00 : f32
    %52 = vector.broadcast %cst_16 : f32 to vector<16x1xf32>
    %53 = arith.maximumf %51, %52 : vector<16x1xf32>
    %54 = vector.broadcast %44 : vector<16x1xf32> to vector<16x128xf32>
    %55 = arith.subf %40, %54 : vector<16x128xf32>
    %cst_17 = arith.constant 9.99999974E-6 : f32
    %56 = vector.broadcast %cst_17 : f32 to vector<16x1xf32>
    %57 = arith.addf %53, %56 : vector<16x1xf32>
    %58 = math.rsqrt %57 : vector<16x1xf32>
    %59 = vector.broadcast %58 : vector<16x1xf32> to vector<16x128xf32>
    %60 = arith.mulf %55, %59 : vector<16x128xf32>
    %61 = vector.broadcast %5 : vector<1x128xf32> to vector<16x128xf32>
    %62 = arith.mulf %60, %61 : vector<16x128xf32>
    %63 = vector.broadcast %6 : vector<1x128xf32> to vector<16x128xf32>
    %64 = arith.addf %62, %63 : vector<16x128xf32>
    %c0_18 = arith.constant 0 : index
    %c0_19 = arith.constant 0 : index
    %65 = vector.load %arg4[%c0_18, %c0_19] : memref<128x128xf32, #tpu.memory_space<vmem>>, vector<128x128xf32>
    %cst_20 = arith.constant dense<0.000000e+00> : vector<16x128xf32>
    %66 = tpu.matmul %64, %65, %cst_20 {dimension_numbers = #tpu.dot_dimension_numbers<[1], [0], [0], [1], [0, 0, 1, 1], [], []>} : vector<16x128xf32>, vector<128x128xf32>, vector<16x128xf32> -> vector<16x128xf32>
    %67 = vector.broadcast %7 : vector<1x128xf32> to vector<16x128xf32>
    %68 = arith.addf %66, %67 : vector<16x128xf32>
    %cst_21 = arith.constant 0.000000e+00 : f32
    %69 = vector.broadcast %cst_21 : f32 to vector<16x128xf32>
    %70 = arith.maximumf %68, %69 : vector<16x128xf32>
    %cst_22 = arith.constant dense<0.000000e+00> : vector<16xf32>
    %71 = vector.multi_reduction <add>, %70, %cst_22 [1] : vector<16x128xf32> to vector<16xf32>
    %72 = vector.shape_cast %71 : vector<16xf32> to vector<16x1xf32>
    %cst_23 = arith.constant 3.125000e-02 : f32
    %73 = vector.broadcast %cst_23 : f32 to vector<16x1xf32>
    %74 = arith.mulf %72, %73 : vector<16x1xf32>
    %75 = arith.mulf %70, %70 : vector<16x128xf32>
    %cst_24 = arith.constant dense<0.000000e+00> : vector<16xf32>
    %76 = vector.multi_reduction <add>, %75, %cst_24 [1] : vector<16x128xf32> to vector<16xf32>
    %77 = vector.shape_cast %76 : vector<16xf32> to vector<16x1xf32>
    %cst_25 = arith.constant 3.125000e-02 : f32
    %78 = vector.broadcast %cst_25 : f32 to vector<16x1xf32>
    %79 = arith.mulf %77, %78 : vector<16x1xf32>
    %80 = arith.mulf %74, %74 : vector<16x1xf32>
    %81 = arith.subf %79, %80 : vector<16x1xf32>
    %cst_26 = arith.constant 0.000000e+00 : f32
    %82 = vector.broadcast %cst_26 : f32 to vector<16x1xf32>
    %83 = arith.maximumf %81, %82 : vector<16x1xf32>
    %84 = vector.broadcast %74 : vector<16x1xf32> to vector<16x128xf32>
    %85 = arith.subf %70, %84 : vector<16x128xf32>
    %cst_27 = arith.constant 9.99999974E-6 : f32
    %86 = vector.broadcast %cst_27 : f32 to vector<16x1xf32>
    %87 = arith.addf %83, %86 : vector<16x1xf32>
    %88 = math.rsqrt %87 : vector<16x1xf32>
    %89 = vector.broadcast %88 : vector<16x1xf32> to vector<16x128xf32>
    %90 = arith.mulf %85, %89 : vector<16x128xf32>
    %91 = vector.broadcast %8 : vector<1x128xf32> to vector<16x128xf32>
    %92 = arith.mulf %90, %91 : vector<16x128xf32>
    %93 = vector.broadcast %9 : vector<1x128xf32> to vector<16x128xf32>
    %94 = arith.addf %92, %93 : vector<16x128xf32>
    %c0_28 = arith.constant 0 : index
    %c0_29 = arith.constant 0 : index
    %95 = vector.load %arg5[%c0_28, %c0_29] : memref<128x128xf32, #tpu.memory_space<vmem>>, vector<128x128xf32>
    %cst_30 = arith.constant dense<0.000000e+00> : vector<16x128xf32>
    %96 = tpu.matmul %94, %95, %cst_30 {dimension_numbers = #tpu.dot_dimension_numbers<[1], [0], [0], [1], [0, 0, 1, 1], [], []>} : vector<16x128xf32>, vector<128x128xf32>, vector<16x128xf32> -> vector<16x128xf32>
    %97 = vector.broadcast %10 : vector<1x128xf32> to vector<16x128xf32>
    %98 = arith.addf %96, %97 : vector<16x128xf32>
    %c0_31 = arith.constant 0 : index
    %c0_32 = arith.constant 0 : index
    %99 = vector.load %arg6[%c0_31, %c0_32] : memref<16x128xf32, #tpu.memory_space<vmem>>, vector<16x128xf32>
    tpu.vector_store %arg6[%c0_31, %c0_32], %98 {strides = array<i32>} : memref<16x128xf32, #tpu.memory_space<vmem>>, vector<16x128xf32>,
    return
  }
  func.func @transform_0(%arg0: i32) -> (i32, i32) {
    %c0_i32 = arith.constant 0 : i32
    %c0_i32_0 = arith.constant 0 : i32
    return %arg0, %c0_i32 : i32, i32
  }
  func.func @transform_1(%arg0: i32) -> (i32, i32) {
    %c0_i32 = arith.constant 0 : i32
    %c0_i32_0 = arith.constant 0 : i32
    %c0_i32_1 = arith.constant 0 : i32
    return %c0_i32, %c0_i32_0 : i32, i32
  }
  func.func @transform_2(%arg0: i32) -> (i32, i32) {
    %c0_i32 = arith.constant 0 : i32
    %c0_i32_0 = arith.constant 0 : i32
    %c0_i32_1 = arith.constant 0 : i32
    return %c0_i32, %c0_i32_0 : i32, i32
  }
  func.func @transform_3(%arg0: i32) -> (i32, i32) {
    %c0_i32 = arith.constant 0 : i32
    %c0_i32_0 = arith.constant 0 : i32
    %c0_i32_1 = arith.constant 0 : i32
    return %c0_i32, %c0_i32_0 : i32, i32
  }
  func.func @transform_4(%arg0: i32) -> (i32, i32) {
    %c0_i32 = arith.constant 0 : i32
    %c0_i32_0 = arith.constant 0 : i32
    %c0_i32_1 = arith.constant 0 : i32
    return %c0_i32, %c0_i32_0 : i32, i32
  }
  func.func @transform_5(%arg0: i32) -> (i32, i32) {
    %c0_i32 = arith.constant 0 : i32
    %c0_i32_0 = arith.constant 0 : i32
    return %arg0, %c0_i32 : i32, i32
  }
}

</mosaic_0001>

<bundles_post_ra>
// kernel: predictor_forward.1
= control target key start
LH: loop header
LB: loop body
LE: loop exit
PB: predicated region body
PF: predicated region fallthrough
CT: control target
= control target key end

     0   :  { %s1007_s0 = inlined_call_operand.vmem [shape: f32[16,128], index: 0, kind: input, shape index: {}]   ;;  %s1008_s1 = inlined_call_operand.vmem [shape: f32[16,128], index: 1, kind: input, shape index: {}]   ;;  %s1009_s2 = inlined_call_operand.vmem [shape: f32[128,128], index: 2, kind: input, shape index: {}]   ;;  %s1010_s3 = inlined_call_operand.vmem [shape: f32[128,128], index: 3, kind: input, shape index: {}]   ;;  %s1011_s4 = inlined_call_operand.vmem [shape: f32[128,128], index: 4, kind: input, shape index: {}]   ;;  %s1012_s5 = inlined_call_operand.hbm [shape: f32[16,128], index: 5, kind: output, shape index: {}]  }
   0x1   :  { %v782_v0 = vld [vmem:[%s1007_s0] sm:$0xff]  ;;  %v787_v1 = vld [vmem:[%s1007_s0 + $0x8] sm:$0xff] }
   0x2   :  { %v65_v2 = vld [vmem:[%s1009_s2] sm:$0xff]  ;;  %25 = vadd.xlane.f32.xlu0 %v782_v0  ;;  %v31_v3 = vmul.f32 %v782_v0, %v782_v0  ;;  %v66_v4 = vld [vmem:[%s1009_s2 + $0x8] sm:$0xff] }
   0x3   :  { %10 = vsyncpa [#allocation3], 0  ;;  %v611_v5 = vpack.c.bf16 %v66_v4, %v65_v2  ;;  %v32_v6 = vmul.f32 %v787_v1, %v787_v1  ;;  %v67_v7 = vld [vmem:[%s1009_s2 + $0x10] sm:$0xff]  ;;  %v68_v8 = vld [vmem:[%s1009_s2 + $0x18] sm:$0xff]  ;;  %v53_v40 = vlaneseq  ;;  %s746_s12 = smov [#allocation2]  }
   0x4   :  { %33 = vadd.xlane.f32.xlu1 %v31_v3  ;;  %v615_v9 = vpack.c.bf16 %v68_v8, %v67_v7  ;;  %v69_v10 = vld [vmem:[%s1009_s2 + $0x20] sm:$0xff]  ;;  %v70_v11 = vld [vmem:[%s1009_s2 + $0x28] sm:$0xff]  ;;  %v71_v13 = vld [vmem:[%s1009_s2 + $0x30] sm:$0xff]  ;;  %s441_s13 = sshll.u32 %s746_s12, 4  ;;  %s442_s13 = int_to_ptr.vmem [resolvable:$true] %s441_s13 }
   0x5   :  { %612 = vmatprep.subr.bf16.mxu0 %v611_v5  ;;  %v619_v12 = vpack.c.bf16 %v70_v11, %v69_v10  ;;  %v72_v14 = vld [vmem:[%s1009_s2 + $0x38] sm:$0xff]  ;;  %v73_v16 = vld [vmem:[%s1009_s2 + $0x40] sm:$0xff]  ;;  %v74_v17 = vld [vmem:[%s1009_s2 + $0x48] sm:$0xff]  ;;  %v843_v44 = vshrl.u32 %v53_v40, 7  ;;  %s722_s14 = scalar_lea.vmem %s442_s13, 256  ;;  %p727_p1 = scmp.lt.s32.totalorder %s442_s13, %s442_s13 }
   0x6   :  { %27 = vadd.xlane.f32.xlu0 %v787_v1  ;;  %614 = vmatpush3.bf16.msra.mxu0 %v611_v5  ;;  %v623_v15 = vpack.c.bf16 %v72_v14, %v71_v13  ;;  %v627_v18 = vpack.c.bf16 %v74_v17, %v73_v16  ;;  %v75_v19 = vld [vmem:[%s1009_s2 + $0x50] sm:$0xff]  ;;  %v76_v20 = vld [vmem:[%s1009_s2 + $0x58] sm:$0xff]  ;;  %v77_v21 = vld [vmem:[%s1009_s2 + $0x60] sm:$0xff]  ;;  %p723_p0 = scmp.ne.s32.totalorder %s442_s13, %s722_s14  ;;  %p728_p2 = scmp.lt.s32.totalorder %s722_s14, %s722_s14 }
   0x7   :  { %616 = vmatprep.subr.bf16.mxu0 %v615_v9  ;;  %v631_v22 = vpack.c.bf16 %v76_v20, %v75_v19  ;;  %v78_v23 = vld [vmem:[%s1009_s2 + $0x68] sm:$0xff]  ;;  %v79_v25 = vld [vmem:[%s1009_s2 + $0x70] sm:$0xff]  ;;  %v80_v26 = vld [vmem:[%s1009_s2 + $0x78] sm:$0xff]  ;;  %v55_v46 = vsub.s32 0, %v843_v44  ;;  %v61_v48 = vsub.s32 1, %v843_v44 }
   0x8   :  { %35 = vadd.xlane.f32.xlu1 %v32_v6  ;;  %v635_v24 = vpack.c.bf16 %v78_v23, %v77_v21  ;;  %v639_v27 = vpack.c.bf16 %v80_v26, %v79_v25  ;;  %v849_v47 = vld [vmem:[%s1008_s1] sm:$0xff]  ;;  %v203_v62 = vld [vmem:[%s1010_s3 + $0x8] sm:$0xff]  ;;  %v204_v10 = vld [vmem:[%s1010_s3 + $0x10] sm:$0xff]  ;;  %p729_p3 = por %p728_p2, %p727_p1 }
   0x9   :  { %v56_v50 = vrot.slane %v849_v47, %v55_v46  ;;  %v62_v53 = vrot.slane %v849_v47, %v61_v48  ;;  %v202_v61 = vld [vmem:[%s1010_s3] sm:$0xff]  ;;  %v205_v11 = vld [vmem:[%s1010_s3 + $0x18] sm:$0xff]  ;;  %v207_v14 = vld [vmem:[%s1010_s3 + $0x28] sm:$0xff] }
   0xa   :  { %618 = vmatpush3.bf16.msra.mxu0 %v615_v9  ;;  %v643_v63 = vpack.c.bf16 %v203_v62, %v202_v61  ;;  %v206_v13 = vld [vmem:[%s1010_s3 + $0x20] sm:$0xff]  ;;  %v208_v16 = vld [vmem:[%s1010_s3 + $0x30] sm:$0xff]  ;;  %v209_v17 = vld [vmem:[%s1010_s3 + $0x38] sm:$0xff]  ;;  %p730_p4 = pnand %p729_p3, %p723_p0 }
   0xb   :  { %620 = vmatprep.subr.bf16.mxu0 %v619_v12  ;;  %v210_v19 = vld [vmem:[%s1010_s3 + $0x40] sm:$0xff]  ;;  %v211_v20 = vld [vmem:[%s1010_s3 + $0x48] sm:$0xff]  ;;  %v213_v23 = vld [vmem:[%s1010_s3 + $0x58] sm:$0xff] }
   0xc   :  { %644 = vmatprep.subr.bf16.mxu1 %v643_v63  ;;  %v659_v21 = vpack.c.bf16 %v211_v20, %v210_v19  ;;  %v214_v25 = vld [vmem:[%s1010_s3 + $0x60] sm:$0xff]  ;;  %v215_v26 = vld [vmem:[%s1010_s3 + $0x68] sm:$0xff]  ;;  %v345_v19 = vld [vmem:[%s1011_s4 + $0x30] sm:$0xff] }
   0xd   :  { %646 = vmatpush3.bf16.msra.mxu1 %v643_v63  ;;  %v346_v20 = vld [vmem:[%s1011_s4 + $0x38] sm:$0xff] }
   0xe   :  { %622 = vmatpush3.bf16.msra.mxu0 %v619_v12  ;;  %v647_v12 = vpack.c.bf16 %v205_v11, %v204_v10 }
   0xf   :  { %624 = vmatprep.subr.bf16.mxu0 %v623_v15 }
  0x10   :  { %648 = vmatprep.subr.bf16.mxu1 %v647_v12 }
  0x11   :  { %650 = vmatpush3.bf16.msra.mxu1 %v647_v12 }
  0x12   :  { %626 = vmatpush3.bf16.msra.mxu0 %v623_v15  ;;  %v651_v15 = vpack.c.bf16 %v207_v14, %v206_v13  ;;  %v341_v13 = vld [vmem:[%s1011_s4 + $0x10] sm:$0xff]  ;;  %v342_v14 = vld [vmem:[%s1011_s4 + $0x18] sm:$0xff] }
  0x13   :  { %628 = vmatprep.subr.bf16.mxu0 %v627_v18 }
  0x14   :  { %652 = vmatprep.subr.bf16.mxu1 %v651_v15 }
  0x15   :  { %654 = vmatpush3.bf16.msra.mxu1 %v651_v15  ;;  %v679_v15 = vpack.c.bf16 %v342_v14, %v341_v13 }
  0x16   :  { %630 = vmatpush3.bf16.msra.mxu0 %v627_v18  ;;  %v655_v18 = vpack.c.bf16 %v209_v17, %v208_v16  ;;  %v343_v16 = vld [vmem:[%s1011_s4 + $0x20] sm:$0xff]  ;;  %v344_v17 = vld [vmem:[%s1011_s4 + $0x28] sm:$0xff] }
  0x17   :  { %632 = vmatprep.subr.bf16.mxu0 %v631_v22 }
  0x18   :  { %656 = vmatprep.subr.bf16.mxu1 %v655_v18 }
  0x19   :  { %658 = vmatpush3.bf16.msra.mxu1 %v655_v18  ;;  %v683_v18 = vpack.c.bf16 %v344_v17, %v343_v16 }
  0x1a   :  { %634 = vmatpush3.bf16.msra.mxu0 %v631_v22  ;;  %v212_v22 = vld [vmem:[%s1010_s3 + $0x50] sm:$0xff]  ;;  %660 = vmatprep.subr.bf16.mxu1 %v659_v21 }
  0x1b   :  { %636 = vmatprep.subr.bf16.mxu0 %v635_v24 }
  0x1d   :  { %662 = vmatpush3.bf16.msra.mxu1 %v659_v21  ;;  %v687_v21 = vpack.c.bf16 %v346_v20, %v345_v19 }
  0x1e   :  { %638 = vmatpush3.bf16.msra.mxu0 %v635_v24  ;;  %v663_v24 = vpack.c.bf16 %v213_v23, %v212_v22  ;;  %v347_v22 = vld [vmem:[%s1011_s4 + $0x40] sm:$0xff]  ;;  %v348_v23 = vld [vmem:[%s1011_s4 + $0x48] sm:$0xff] }
  0x1f   :  { %640 = vmatprep.subr.bf16.mxu0 %v639_v27 }
  0x20   :  { %664 = vmatprep.subr.bf16.mxu1 %v663_v24 }
  0x21   :  { %666 = vmatpush3.bf16.msra.mxu1 %v663_v24  ;;  %v691_v24 = vpack.c.bf16 %v348_v23, %v347_v22 }
  0x22   :  { %642 = vmatpush3.bf16.msra.mxu0 %v639_v27  ;;  %v667_v27 = vpack.c.bf16 %v215_v26, %v214_v25  ;;  %v349_v25 = vld [vmem:[%s1011_s4 + $0x50] sm:$0xff]  ;;  %v350_v26 = vld [vmem:[%s1011_s4 + $0x58] sm:$0xff] }
  0x24   :  { %668 = vmatprep.subr.bf16.mxu1 %v667_v27 }
  0x25   :  { %670 = vmatpush3.bf16.msra.mxu1 %v667_v27  ;;  %v695_v27 = vpack.c.bf16 %v350_v26, %v349_v25 }
  0x8f   :  { %v26_v28 = vpop.xlane.xlu0 %25 }
  0x90   :  { %v29_v29 = vmul.f32 0.041666668, %v26_v28  ;;  %v216_v28 = vld [vmem:[%s1010_s3 + $0x70] sm:$0xff] }
  0x91   :  { %v34_v30 = vpop.xlane.xlu1 %33 }
  0x92   :  { %v39_v31 = vmul.f32 %v29_v29, %v29_v29  ;;  %v37_v32 = vmul.f32 0.041666668, %v34_v30  ;;  %v45_v49 = vsub.f32 %v782_v0, %v29_v29  ;;  %v83_v0 = vsub.s32 2, %v843_v44  ;;  %v217_v29 = vld [vmem:[%s1010_s3 + $0x78] sm:$0xff] }
  0x93   :  { %v28_v33 = vpop.xlane.xlu0 %27  ;;  %v671_v30 = vpack.c.bf16 %v217_v29, %v216_v28  ;;  %v351_v28 = vld [vmem:[%s1011_s4 + $0x60] sm:$0xff]  ;;  %v352_v29 = vld [vmem:[%s1011_s4 + $0x68] sm:$0xff] }
  0x94   :  { %v41_v34 = vsub.f32 %v37_v32, %v39_v31  ;;  %v30_v35 = vmul.f32 0.041666668, %v28_v33 }
  0x95   :  { %v36_v36 = vpop.xlane.xlu1 %35  ;;  %672 = vmatprep.subr.bf16.mxu1 %v671_v30 }
  0x96   :  { %v43_v37 = vmax.f32 %v41_v34, 0.0  ;;  %v40_v38 = vmul.f32 %v30_v35, %v30_v35  ;;  %v38_v39 = vmul.f32 0.041666668, %v36_v36  ;;  %v46_v54 = vsub.f32 %v787_v1, %v30_v35  ;;  %674 = vmatpush3.bf16.msra.mxu1 %v671_v30 }
  0x97   :  { %v84_v1 = vrot.slane %v849_v47, %v83_v0  ;;  %v339_v0 = vld [vmem:[%s1011_s4] sm:$0xff]  ;;  %v699_v30 = vpack.c.bf16 %v352_v29, %v351_v28 }
  0x98   :  { %v47_v41 = vadd.f32 1e-05, %v43_v37  ;;  %v42_v42 = vsub.f32 %v38_v39, %v40_v38 }
  0x9a   :  { %710 = vrsqrt.f32 %v47_v41  ;;  %v44_v43 = vmax.f32 %v42_v42, 0.0 }
  0x9c   :  { %v48_v45 = vadd.f32 1e-05, %v44_v43 }
  0x9e   :  { %712 = vrsqrt.f32 %v48_v45 }
  0xa4   :  { %v711_v51 = vpop.eup %710 }
  0xa5   :  { %v51_v52 = vmul.f32 %v711_v51, %v45_v49  ;;  %v198_v51 = vsub.s32 4, %v843_v44 }
  0xa7   :  { %v57_v55 = vmul.f32 %v56_v50, %v51_v52 }
  0xa8   :  { %v713_v56 = vpop.eup %712 }
  0xa9   :  { %v63_v57 = vadd.f32 %v62_v53, %v57_v55  ;;  %v52_v58 = vmul.f32 %v713_v56, %v46_v54 }
  0xab   :  { %538 = vmatprep.mubr.f32.mxu0 %v63_v57  ;;  %v58_v59 = vmul.f32 %v56_v50, %v52_v58  ;;  %v192_v50 = vsub.s32 3, %v843_v44 }
  0xad   :  { %v64_v60 = vadd.f32 %v62_v53, %v58_v59  ;;  %v193_v53 = vrot.slane %v849_v47, %v192_v50  ;;  %v199_v59 = vrot.slane %v849_v47, %v198_v51 }
  0xaf   :  { %539 = vmatmul.mubr.f32.vlgmr.msra.gmra.mrb[0].mxu0 %v64_v60 }
 0x182   :  { %v540_v2 = vpop.f32.mrb[0].mxu0 }
 0x183   :  { %v157_v3 = vadd.f32 %v540_v2, %v84_v1  ;;  %v151_v4 = vpop.f32.mrb[1].mxu0 }
 0x184   :  { %v152_v5 = vadd.f32 %v151_v4, %v84_v1  ;;  %v340_v1 = vld [vmem:[%s1011_s4 + $0x8] sm:$0xff] }
 0x185   :  { %v866_v6 = vmax.f32 %v157_v3, 0.0  ;;  %v675_v2 = vpack.c.bf16 %v340_v1, %v339_v0  ;;  %v220_v3 = vsub.s32 5, %v843_v44 }
 0x186   :  { %v868_v7 = vmax.f32 %v152_v5, 0.0 }
 0x187   :  { %164 = vadd.xlane.f32.xlu1 %v866_v6  ;;  %v169_v8 = vmul.f32 %v866_v6, %v866_v6  ;;  %676 = vmatprep.subr.bf16.mxu0 %v675_v2  ;;  %v221_v4 = vrot.slane %v849_v47, %v220_v3  ;;  %v24_v3 = vld [vmem:[%s1008_s1 + $0x8] sm:$0xff] }
 0x188   :  { %162 = vadd.xlane.f32.xlu0 %v868_v7  ;;  %v168_v9 = vmul.f32 %v868_v7, %v868_v7  ;;  %678 = vmatpush3.bf16.msra.mxu0 %v675_v2 }
 0x189   :  { %680 = vmatprep.subr.bf16.mxu0 %v679_v15 }
 0x18b   :  { %172 = vadd.xlane.f32.xlu1 %v169_v8 }
 0x18c   :  { %170 = vadd.xlane.f32.xlu0 %v168_v9  ;;  %682 = vmatpush3.bf16.msra.mxu0 %v679_v15 }
 0x18d   :  { %684 = vmatprep.subr.bf16.mxu0 %v683_v18 }
 0x190   :  { %686 = vmatpush3.bf16.msra.mxu0 %v683_v18 }
 0x191   :  { %688 = vmatprep.subr.bf16.mxu0 %v687_v21 }
 0x194   :  { %690 = vmatpush3.bf16.msra.mxu0 %v687_v21 }
 0x195   :  { %692 = vmatprep.subr.bf16.mxu0 %v691_v24 }
 0x198   :  { %694 = vmatpush3.bf16.msra.mxu0 %v691_v24 }
 0x199   :  { %696 = vmatprep.subr.bf16.mxu0 %v695_v27 }
 0x19c   :  { %698 = vmatpush3.bf16.msra.mxu0 %v695_v27 }
 0x19d   :  { %700 = vmatprep.subr.bf16.mxu0 %v699_v30 }
 0x1a0   :  { %702 = vmatpush3.bf16.msra.mxu0 %v699_v30 }
 0x214   :  { %v165_v31 = vpop.xlane.xlu1 %164 }
 0x215   :  { %v167_v32 = vmul.f32 0.03125, %v165_v31  ;;  %v163_v33 = vpop.xlane.xlu0 %162  ;;  %v353_v31 = vld [vmem:[%s1011_s4 + $0x70] sm:$0xff] }
 0x216   :  { %v166_v34 = vmul.f32 0.03125, %v163_v33 }
 0x217   :  { %v177_v36 = vmul.f32 %v167_v32, %v167_v32  ;;  %v183_v52 = vsub.f32 %v866_v6, %v167_v32  ;;  %v354_v32 = vld [vmem:[%s1011_s4 + $0x78] sm:$0xff] }
 0x218   :  { %v173_v35 = vpop.xlane.xlu1 %172  ;;  %v176_v39 = vmul.f32 %v166_v34, %v166_v34  ;;  %v182_v55 = vsub.f32 %v868_v7, %v166_v34  ;;  %v703_v33 = vpack.c.bf16 %v354_v32, %v353_v31 }
 0x219   :  { %v175_v37 = vmul.f32 0.03125, %v173_v35  ;;  %v171_v38 = vpop.xlane.xlu0 %170 }
 0x21a   :  { %v174_v40 = vmul.f32 0.03125, %v171_v38  ;;  %704 = vmatprep.subr.bf16.mxu0 %v703_v33 }
 0x21b   :  { %v179_v41 = vsub.f32 %v175_v37, %v177_v36  ;;  %706 = vmatpush3.bf16.msra.mxu0 %v703_v33 }
 0x21c   :  { %v178_v42 = vsub.f32 %v174_v40, %v176_v39 }
 0x21d   :  { %v181_v43 = vmax.f32 %v179_v41, 0.0 }
 0x21e   :  { %v180_v45 = vmax.f32 %v178_v42, 0.0 }
 0x21f   :  { %v185_v48 = vadd.f32 1e-05, %v181_v43 }
 0x220   :  { %v184_v49 = vadd.f32 1e-05, %v180_v45 }
 0x221   :  { %714 = vrsqrt.f32 %v185_v48 }
 0x222   :  { %716 = vrsqrt.f32 %v184_v49 }
 0x22b   :  { %v715_v54 = vpop.eup %714 }
 0x22c   :  { %v717_v56 = vpop.eup %716  ;;  %v189_v57 = vmul.f32 %v715_v54, %v183_v52  ;;  %v335_v54 = vsub.s32 7, %v843_v44 }
 0x22d   :  { %v188_v58 = vmul.f32 %v717_v56, %v182_v55 }
 0x22e   :  { %v195_v60 = vmul.f32 %v193_v53, %v189_v57 }
 0x22f   :  { %v194_v61 = vmul.f32 %v193_v53, %v188_v58  ;;  %v329_v53 = vsub.s32 6, %v843_v44 }
 0x230   :  { %v201_v63 = vadd.f32 %v199_v59, %v195_v60 }
 0x231   :  { %v200_v62 = vadd.f32 %v199_v59, %v194_v61  ;;  %v330_v56 = vrot.slane %v849_v47, %v329_v53 }
 0x233   :  { %573 = vmatprep.mubr.f32.mxu1 %v200_v62  ;;  %v336_v62 = vrot.slane %v849_v47, %v335_v54 }
 0x234   :  { %574 = vmatmul.mubr.f32.vlgmr.msra.gmra.mrb[0].mxu1 %v201_v63 }
 0x307   :  { %v575_v5 = vpop.f32.mrb[0].mxu1 }
 0x308   :  { %v294_v6 = vadd.f32 %v575_v5, %v221_v4  ;;  %v288_v7 = vpop.f32.mrb[1].mxu1 }
 0x309   :  { %v289_v8 = vadd.f32 %v288_v7, %v221_v4  ;;  %v358_v4 = vrot.slane %v24_v3, %v55_v46 }
 0x30a   :  { %v932_v9 = vmax.f32 %v294_v6, 0.0 }
 0x30b   :  { %v934_v10 = vmax.f32 %v289_v8, 0.0 }
 0x30c   :  { %301 = vadd.xlane.f32.xlu1 %v932_v9  ;;  %v306_v11 = vmul.f32 %v932_v9, %v932_v9 }
 0x30d   :  { %299 = vadd.xlane.f32.xlu0 %v934_v10  ;;  %v305_v12 = vmul.f32 %v934_v10, %v934_v10 }
 0x310   :  { %309 = vadd.xlane.f32.xlu1 %v306_v11 }
 0x311   :  { %307 = vadd.xlane.f32.xlu0 %v305_v12 }
 0x399   :  { %v302_v34 = vpop.xlane.xlu1 %301 }
 0x39a   :  { %v304_v35 = vmul.f32 0.03125, %v302_v34  ;;  %v300_v36 = vpop.xlane.xlu0 %299 }
 0x39b   :  { %v303_v37 = vmul.f32 0.03125, %v300_v36 }
 0x39c   :  { %v314_v39 = vmul.f32 %v304_v35, %v304_v35  ;;  %v320_v55 = vsub.f32 %v932_v9, %v304_v35 }
 0x39d   :  { %v310_v38 = vpop.xlane.xlu1 %309  ;;  %v313_v42 = vmul.f32 %v303_v37, %v303_v37  ;;  %v319_v58 = vsub.f32 %v934_v10, %v303_v37 }
 0x39e   :  { %v312_v40 = vmul.f32 0.03125, %v310_v38  ;;  %v308_v41 = vpop.xlane.xlu0 %307 }
 0x39f   :  { %v311_v43 = vmul.f32 0.03125, %v308_v41 }
 0x3a0   :  { %v316_v45 = vsub.f32 %v312_v40, %v314_v39 }
 0x3a1   :  { %v315_v48 = vsub.f32 %v311_v43, %v313_v42 }
 0x3a2   :  { %v318_v49 = vmax.f32 %v316_v45, 0.0 }
 0x3a3   :  { %v317_v50 = vmax.f32 %v315_v48, 0.0 }
 0x3a4   :  { %v322_v51 = vadd.f32 1e-05, %v318_v49 }
 0x3a5   :  { %v321_v52 = vadd.f32 1e-05, %v317_v50 }
 0x3a6   :  { %718 = vrsqrt.f32 %v322_v51 }
 0x3a7   :  { %720 = vrsqrt.f32 %v321_v52 }
 0x3b0   :  { %v719_v57 = vpop.eup %718 }
 0x3b1   :  { %v721_v59 = vpop.eup %720  ;;  %v326_v60 = vmul.f32 %v719_v57, %v320_v55 }
 0x3b2   :  { %v325_v61 = vmul.f32 %v721_v59, %v319_v58 }
 0x3b3   :  { %v332_v63 = vmul.f32 %v330_v56, %v326_v60 }
 0x3b4   :  { %v331_v0 = vmul.f32 %v330_v56, %v325_v61 }
 0x3b5   :  { %v338_v2 = vadd.f32 %v336_v62, %v332_v63 }
 0x3b6   :  { %v337_v1 = vadd.f32 %v336_v62, %v331_v0 }
 0x3b8   :  { %608 = vmatprep.mubr.f32.mxu0 %v337_v1 }
 0x3b9   :  { %609 = vmatmul.mubr.f32.vlgmr.msra.gmra.mrb[2].mxu0 %v338_v2 }
 0x48c   :  { %v610_v5 = vpop.f32.mrb[2].mxu0 }
 0x48d   :  { %v431_v6 = vadd.f32 %v610_v5, %v358_v4  ;;  %v425_v7 = vpop.f32.mrb[3].mxu0 }
 0x48e   :  { %v426_v47 = vadd.f32 %v425_v7, %v358_v4 }
 0x48f   :  { %435 = vst [vmem:[#allocation2 + $0x8] sm:$0xff] %v431_v6 }
 0x490   :  { %434 = vst [vmem:[#allocation2] sm:$0xff] %v426_v47 }
 0x491   :  { %733 = shalt.err (!%p730_p4)
}
 0x492   :  { %s734_s16 = scalar_lea.hbm %s1012_s5, 256 }
 0x493   :  { %p735_p5 = scmp.ne.s32.totalorder %s1012_s5, %s734_s16  ;;  %p738_p6 = scmp.lt.u32.totalorder %s734_s16, %s1012_s5 }
 0x495   :  { %p740_p7 = pnand %p738_p6, %p735_p5 }
 0x497   :  { %743 = shalt.err (!%p740_p7)
}
 0x498   :  { %s747_s21 = smov 128   ;;  %s748_s22 = smov 8  }
 0x499   :  { %447 = dma.vmem_to_hbm [thread:$0]  %s442_s13, 256, %s1012_s5, [#allocation3], %s747_s21, %s747_s21, %s748_s22  }
 0x49a   :  { %744 = dma.done.wait [#allocation3], 256  }
 0x49b   :  { %745 = vsyncadd [#allocation3], 4294967040 }
 0x49c   :  { %451 = vsyncpa [#allocation3], 1 }

</bundles_post_ra>
